<compile_context>
chip_gen: v6e
topology: v6e:2x2x1
jax: 0.10.0
libtpu: 0.0.40
codegen_flags: <defaults>
</compile_context>

<pallas_src>
import re

import jax
import jax.numpy as jnp
from jax.experimental import pallas as pl
from jax.experimental.pallas import tpu as pltpu


def _gelu_tanh(x):
    # GELU with tanh approximation (matches torch.nn.GELU(approximate='tanh'))
    c = 0.7978845608028654  # sqrt(2/pi)
    return 0.5 * x * (1.0 + jnp.tanh(c * (x + 0.044715 * x * x * x)))


def mlp_kernel(x_ref, wfc_ref, bfc_ref, wproj_ref, bproj_ref, o_ref, acc_ref):
    h_idx = pl.program_id(1)

    @pl.when(h_idx == 0)
    def _():
        acc_ref[...] = jnp.zeros_like(acc_ref)

    # c_fc chunk: (tm, Dp) @ (Dp, th) on the MXU, f32 accumulate.
    h = jnp.dot(x_ref[...], wfc_ref[...], preferred_element_type=jnp.float32)
    # bias + GELU (tanh approx) in f32 on VPU/EUP.
    h = _gelu_tanh(h + bfc_ref[...])
    # c_proj chunk: (tm, th) @ (th, Dp), accumulated into f32 scratch.
    acc_ref[...] += jnp.dot(h.astype(wproj_ref.dtype), wproj_ref[...],
                            preferred_element_type=jnp.float32)

    @pl.when(h_idx == pl.num_programs(1) - 1)
    def _():
        o_ref[...] = (acc_ref[...] + bproj_ref[...]).astype(o_ref.dtype)


def _round_up(x, m):
    return ((x + m - 1) // m) * m


def _tpu_generation():
    """Best-effort TPU generation from device_kind ('TPU v5e' -> 5, ...)."""
    try:
        kind = jax.devices()[0].device_kind
    except Exception:
        return 6
    m = re.search(r"(\d+)", kind)
    return int(m.group(1)) if m else 6


def _select_tiles(M, Dp, Hp, gen, compute_itemsize, out_itemsize):
    """Pick (tm, th, vmem_limit_bytes) from the generation's compute/HBM
    balance point and its VMEM capacity."""
    if gen >= 7:        # v7x: 64 MiB VMEM/TC, 2 TCs, balance ~620 FLOPs/B
        tm_target, budget, cap = 512, 44 << 20, 56 << 20
    elif gen == 6:      # v6e: 128 MiB VMEM, balance ~640 FLOPs/B
        tm_target, budget, cap = 768, 92 << 20, 104 << 20
    else:               # v5e and older: 128 MiB VMEM, balance ~240 FLOPs/B
        tm_target, budget, cap = 256, 92 << 20, 100 << 20

    # Row tile: as big as the balance point asks for, but no bigger than M.
    tm = min(tm_target, _round_up(M, 8))
    # v7x megacore: ensure the "parallel" M axis has >= 2 tiles so both
    # TensorCores get work for short-sequence / decode-sized inputs.
    if gen >= 7 and M > 8 and _round_up(M, tm) // tm < 2:
        tm = _round_up((M + 1) // 2, 8)

    def est_bytes(tm_, th_):
        return (2 * tm_ * Dp * compute_itemsize         # x tiles (dbl-buffered)
                + 2 * 2 * Dp * th_ * compute_itemsize   # W_fc + W_proj tiles
                + 2 * (th_ + Dp) * 4                    # bias tiles
                + 2 * tm_ * Dp * out_itemsize           # output tiles
                + tm_ * Dp * 4                          # f32 accumulator
                + tm_ * th_ * 8)                        # h f32 + bf16 cast + GELU temps

    # Hidden tile: prefer multiples of 256 (v6e/v7x MXU is 256x256).
    th = None
    for cand in (512, 256, 128):
        if Hp % cand == 0 and est_bytes(tm, cand) <= budget:
            th = cand
            break
    if th is None:
        th = 128
        while tm > 8 and est_bytes(tm, th) > budget:
            tm = max(8, _round_up(tm // 2, 8))

    vmem_limit = int(min(cap, max(int(est_bytes(tm, th) * 1.5), 32 << 20)))
    return tm, th, vmem_limit


def prepare_mlp_params(w_fc, b_fc, w_proj, b_proj, *,
                       compute_dtype=jnp.bfloat16):
    """Pre-cast / pre-pad the weights ONCE (hoisted out of the per-call path;
    for large models the per-call cast+pad costs as much HBM traffic as the
    kernel itself).  Weights are stored pre-transposed as (in, out) relative
    to PyTorch nn.Linear.  Zero padding is exact: padded rows/cols and padded
    bias entries are zero and the padded outputs are sliced off."""
    D, H = w_fc.shape
    assert w_proj.shape == (H, D) and b_fc.shape == (H,) and b_proj.shape == (D,)
    Dp = _round_up(D, 128)
    Hp = _round_up(H, 128)
    wfc = jnp.pad(jnp.asarray(w_fc, compute_dtype), ((0, Dp - D), (0, Hp - H)))
    wproj = jnp.pad(jnp.asarray(w_proj, compute_dtype), ((0, Hp - H), (0, Dp - D)))
    bfc = jnp.pad(jnp.asarray(b_fc, jnp.float32), (0, Hp - H)).reshape(1, Hp)
    bproj = jnp.pad(jnp.asarray(b_proj, jnp.float32), (0, Dp - D)).reshape(1, Dp)
    return dict(wfc=wfc, bfc=bfc, wproj=wproj, bproj=bproj,
                D=D, H=H, Dp=Dp, Hp=Hp, compute_dtype=compute_dtype)


def mlp_forward_prepared(x, params):
    """x: (B, T, n_embd); params from prepare_mlp_params."""
    D, Dp, Hp = params["D"], params["Dp"], params["Hp"]
    compute_dtype = params["compute_dtype"]
    B, T, Din = x.shape
    assert Din == D
    M = B * T

    gen = _tpu_generation()
    cb = jnp.dtype(compute_dtype).itemsize
    ob = jnp.dtype(x.dtype).itemsize
    tm, th, vmem_limit = _select_tiles(M, Dp, Hp, gen, cb, ob)
    Mp = _round_up(M, tm)

    x2 = x.reshape(M, D).astype(compute_dtype)
    needs_pad = (Mp, Dp) != (M, D)
    if needs_pad:  # skip the extra activation copy in the aligned common case
        x2 = jnp.pad(x2, ((0, Mp - M), (0, Dp - D)))

    grid = (Mp // tm, Hp // th)

    out = pl.pallas_call(
        mlp_kernel,
        out_shape=jax.ShapeDtypeStruct((Mp, Dp), x.dtype),
        grid_spec=pltpu.PrefetchScalarGridSpec(
            num_scalar_prefetch=0,
            grid=grid,
            in_specs=[
                pl.BlockSpec((tm, Dp), lambda i, h: (i, 0)),   # x rows (resident over h)
                pl.BlockSpec((Dp, th), lambda i, h: (0, h)),   # W_fc chunk
                pl.BlockSpec((1, th), lambda i, h: (0, h)),    # b_fc chunk
                pl.BlockSpec((th, Dp), lambda i, h: (h, 0)),   # W_proj chunk
                pl.BlockSpec((1, Dp), lambda i, h: (0, 0)),    # b_proj
            ],
            out_specs=pl.BlockSpec((tm, Dp), lambda i, h: (i, 0)),
            scratch_shapes=[pltpu.VMEM((tm, Dp), jnp.float32)],
        ),
        compiler_params=pltpu.CompilerParams(
            dimension_semantics=("parallel", "arbitrary"),
            vmem_limit_bytes=vmem_limit,
        ),
    )(x2, params["wfc"], params["bfc"], params["wproj"], params["bproj"])

    if needs_pad:
        out = out[:M, :D]
    return out.reshape(B, T, D)


def mlp_forward(x, w_fc, b_fc, w_proj, b_proj, *, compute_dtype=jnp.bfloat16):
    """Convenience wrapper: prepares params per call.  For repeated use,
    call prepare_mlp_params once and mlp_forward_prepared per step."""
    params = prepare_mlp_params(w_fc, b_fc, w_proj, b_proj,
                                compute_dtype=compute_dtype)
    return mlp_forward_prepared(x, params)


def mlp_reference(x, w_fc, b_fc, w_proj, b_proj):
    h = jnp.einsum("btd,dh->bth", x, w_fc) + b_fc
    h = _gelu_tanh(h)
    return jnp.einsum("bth,hd->btd", h, w_proj) + b_proj


if __name__ == "__main__":
    # Small config: batch=2, seq=8, n_embd=32 -> hidden=128
    B, T, D = 2, 8, 32
    H = 4 * D

    key = jax.random.PRNGKey(0)
    kx, k1, k2, k3, k4 = jax.random.split(key, 5)

    x = jax.random.normal(kx, (B, T, D), dtype=jnp.float32)
    # Weights stored pre-transposed as (in, out) relative to PyTorch Linear.
    w_fc = jax.random.normal(k1, (D, H), dtype=jnp.float32) * 0.02
    b_fc = jax.random.normal(k2, (H,), dtype=jnp.float32) * 0.02
    w_proj = jax.random.normal(k3, (H, D), dtype=jnp.float32) * 0.02
    b_proj = jax.random.normal(k4, (D,), dtype=jnp.float32) * 0.02

    # Hoisted weight prep (done once), then the fused kernel.
    params = prepare_mlp_params(w_fc, b_fc, w_proj, b_proj)
    y = mlp_forward_prepared(x, params)
    y = jax.block_until_ready(y)

    y_ref = mlp_reference(x, w_fc, b_fc, w_proj, b_proj)
    assert y.shape == (B, T, D)
    # bf16 matmul inputs / f32 accumulation -> small deviation vs f32 reference.
    assert jnp.allclose(y, y_ref, atol=5e-3, rtol=5e-2), "mismatch vs reference"

    print("KERNEL_OK")
</pallas_src>

<mosaic_0001>
module attributes {stable_mosaic.version = 11 : i64} {
  func.func @mlp_kernel(%arg0: i32, %arg1: i32, %arg2: memref<16x128xbf16, #tpu.memory_space<vmem>>, %arg3: memref<128x128xbf16, #tpu.memory_space<vmem>>, %arg4: memref<1x128xf32, #tpu.memory_space<vmem>>, %arg5: memref<128x128xbf16, #tpu.memory_space<vmem>>, %arg6: memref<1x128xf32, #tpu.memory_space<vmem>>, %arg7: memref<16x128xf32, #tpu.memory_space<vmem>>, %arg8: memref<16x128xf32, #tpu.memory_space<vmem>>) attributes {dimension_semantics = [#tpu.dimension_semantics<parallel>, #tpu.dimension_semantics<arbitrary>], iteration_bounds = array<i64: 1, 1>, scalar_prefetch = 0 : i64, scratch_operands = 1 : i64, tpu.core_type = #tpu.core_type<tc>, window_params = [{transform_indices = @transform_0, window_bounds = array<i64: 16, 128>}, {transform_indices = @transform_1, window_bounds = array<i64: 128, 128>}, {transform_indices = @transform_2, window_bounds = array<i64: 1, 128>}, {transform_indices = @transform_3, window_bounds = array<i64: 128, 128>}, {pipeline_mode = #tpu.pipeline_mode<synchronous>, transform_indices = @transform_4, window_bounds = array<i64: 1, 128>}, {transform_indices = @transform_5, window_bounds = array<i64: 16, 128>}]} {
    %c0_i32 = arith.constant 0 : i32
    %0 = arith.cmpi eq, %arg1, %c0_i32 : i32
    %1 = arith.extui %0 : i1 to i32
    %c0_i32_0 = arith.constant 0 : i32
    %2 = arith.cmpi ne, %1, %c0_i32_0 : i32
    scf.if %2 {
      %cst_19 = arith.constant 0.000000e+00 : f32
      %31 = vector.broadcast %cst_19 : f32 to vector<16x128xf32>
      %c0_20 = arith.constant 0 : index
      %c0_21 = arith.constant 0 : index
      %32 = vector.load %arg8[%c0_20, %c0_21] : memref<16x128xf32, #tpu.memory_space<vmem>>, vector<16x128xf32>
      tpu.vector_store %arg8[%c0_20, %c0_21], %31 {strides = array<i32>} : memref<16x128xf32, #tpu.memory_space<vmem>>, vector<16x128xf32>,
    } else {
    }
    %c0 = arith.constant 0 : index
    %c0_1 = arith.constant 0 : index
    %3 = vector.load %arg2[%c0, %c0_1] : memref<16x128xbf16, #tpu.memory_space<vmem>>, vector<16x128xbf16>
    %c0_2 = arith.constant 0 : index
    %c0_3 = arith.constant 0 : index
    %4 = vector.load %arg3[%c0_2, %c0_3] : memref<128x128xbf16, #tpu.memory_space<vmem>>, vector<128x128xbf16>
    %cst = arith.constant dense<0.000000e+00> : vector<16x128xf32>
    %5 = tpu.matmul %3, %4, %cst {dimension_numbers = #tpu.dot_dimension_numbers<[1], [0], [0], [1], [0, 0, 1, 1], [], []>} : vector<16x128xbf16>, vector<128x128xbf16>, vector<16x128xf32> -> vector<16x128xf32>
    %c0_4 = arith.constant 0 : index
    %c0_5 = arith.constant 0 : index
    %6 = vector.load %arg4[%c0_4, %c0_5] : memref<1x128xf32, #tpu.memory_space<vmem>>, vector<1x128xf32>
    %7 = vector.broadcast %6 : vector<1x128xf32> to vector<16x128xf32>
    %8 = arith.addf %5, %7 : vector<16x128xf32>
    %cst_6 = arith.constant 5.000000e-01 : f32
    %9 = vector.broadcast %cst_6 : f32 to vector<16x128xf32>
    %10 = arith.mulf %9, %8 : vector<16x128xf32>
    %cst_7 = arith.constant 4.471500e-02 : f32
    %11 = vector.broadcast %cst_7 : f32 to vector<16x128xf32>
    %12 = arith.mulf %11, %8 : vector<16x128xf32>
    %13 = arith.mulf %12, %8 : vector<16x128xf32>
    %14 = arith.mulf %13, %8 : vector<16x128xf32>
    %15 = arith.addf %8, %14 : vector<16x128xf32>
    %cst_8 = arith.constant 0.797884583 : f32
    %16 = vector.broadcast %cst_8 : f32 to vector<16x128xf32>
    %17 = arith.mulf %16, %15 : vector<16x128xf32>
    %18 = math.tanh %17 : vector<16x128xf32>
    %cst_9 = arith.constant 1.000000e+00 : f32
    %19 = vector.broadcast %cst_9 : f32 to vector<16x128xf32>
    %20 = arith.addf %19, %18 : vector<16x128xf32>
    %21 = arith.mulf %10, %20 : vector<16x128xf32>
    %c0_10 = arith.constant 0 : index
    %c0_11 = arith.constant 0 : index
    %22 = vector.load %arg8[%c0_10, %c0_11] : memref<16x128xf32, #tpu.memory_space<vmem>>, vector<16x128xf32>
    %23 = arith.truncf %21 : vector<16x128xf32> to vector<16x128xbf16>
    %c0_12 = arith.constant 0 : index
    %c0_13 = arith.constant 0 : index
    %24 = vector.load %arg5[%c0_12, %c0_13] : memref<128x128xbf16, #tpu.memory_space<vmem>>, vector<128x128xbf16>
    %cst_14 = arith.constant dense<0.000000e+00> : vector<16x128xf32>
    %25 = tpu.matmul %23, %24, %cst_14 {dimension_numbers = #tpu.dot_dimension_numbers<[1], [0], [0], [1], [0, 0, 1, 1], [], []>} : vector<16x128xbf16>, vector<128x128xbf16>, vector<16x128xf32> -> vector<16x128xf32>
    %26 = arith.addf %22, %25 : vector<16x128xf32>
    %c0_15 = arith.constant 0 : index
    %c0_16 = arith.constant 0 : index
    %27 = vector.load %arg8[%c0_15, %c0_16] : memref<16x128xf32, #tpu.memory_space<vmem>>, vector<16x128xf32>
    tpu.vector_store %arg8[%c0_15, %c0_16], %26 {strides = array<i32>} : memref<16x128xf32, #tpu.memory_space<vmem>>, vector<16x128xf32>,
    %c0_i32_17 = arith.constant 0 : i32
    %28 = arith.cmpi eq, %arg1, %c0_i32_17 : i32
    %29 = arith.extui %28 : i1 to i32
    %c0_i32_18 = arith.constant 0 : i32
    %30 = arith.cmpi ne, %29, %c0_i32_18 : i32
    scf.if %30 {
      %c0_19 = arith.constant 0 : index
      %c0_20 = arith.constant 0 : index
      %31 = vector.load %arg8[%c0_19, %c0_20] : memref<16x128xf32, #tpu.memory_space<vmem>>, vector<16x128xf32>
      %c0_21 = arith.constant 0 : index
      %c0_22 = arith.constant 0 : index
      %32 = vector.load %arg6[%c0_21, %c0_22] : memref<1x128xf32, #tpu.memory_space<vmem>>, vector<1x128xf32>
      %33 = vector.broadcast %32 : vector<1x128xf32> to vector<16x128xf32>
      %34 = arith.addf %31, %33 : vector<16x128xf32>
      %c0_23 = arith.constant 0 : index
      %c0_24 = arith.constant 0 : index
      %35 = vector.load %arg7[%c0_23, %c0_24] : memref<16x128xf32, #tpu.memory_space<vmem>>, vector<16x128xf32>
      tpu.vector_store %arg7[%c0_23, %c0_24], %34 {strides = array<i32>} : memref<16x128xf32, #tpu.memory_space<vmem>>, vector<16x128xf32>,
    } else {
    }
    return
  }
  func.func @transform_0(%arg0: i32, %arg1: i32) -> (i32, i32) {
    %c0_i32 = arith.constant 0 : i32
    %c0_i32_0 = arith.constant 0 : i32
    return %arg0, %c0_i32 : i32, i32
  }
  func.func @transform_1(%arg0: i32, %arg1: i32) -> (i32, i32) {
    %c0_i32 = arith.constant 0 : i32
    %c0_i32_0 = arith.constant 0 : i32
    return %c0_i32, %arg1 : i32, i32
  }
  func.func @transform_2(%arg0: i32, %arg1: i32) -> (i32, i32) {
    %c0_i32 = arith.constant 0 : i32
    %c0_i32_0 = arith.constant 0 : i32
    return %c0_i32, %arg1 : i32, i32
  }
  func.func @transform_3(%arg0: i32, %arg1: i32) -> (i32, i32) {
    %c0_i32 = arith.constant 0 : i32
    %c0_i32_0 = arith.constant 0 : i32
    return %arg1, %c0_i32 : i32, i32
  }
  func.func @transform_4(%arg0: i32, %arg1: i32) -> (i32, i32) {
    %c0_i32 = arith.constant 0 : i32
    %c0_i32_0 = arith.constant 0 : i32
    %c0_i32_1 = arith.constant 0 : i32
    return %c0_i32, %c0_i32_0 : i32, i32
  }
  func.func @transform_5(%arg0: i32, %arg1: i32) -> (i32, i32) {
    %c0_i32 = arith.constant 0 : i32
    %c0_i32_0 = arith.constant 0 : i32
    return %arg0, %c0_i32 : i32, i32
  }
}

</mosaic_0001>

<bundles_post_ra>
// kernel: tpu_custom_call.1
= control target key start
LH: loop header
LB: loop body
LE: loop exit
PB: predicated region body
PF: predicated region fallthrough
CT: control target
= control target key end

     0   :  { %10 = vsyncpa [#allocation4], 0  ;;  %s605_s0 = inlined_call_operand.hbm [shape: bf16[16,128], index: 0, kind: input, shape index: {}]   ;;  %s606_s1 = inlined_call_operand.hbm [shape: bf16[128,128], index: 1, kind: input, shape index: {}]   ;;  %s607_s2 = inlined_call_operand.vmem [shape: f32[1,128], index: 2, kind: input, shape index: {}]   ;;  %s608_s3 = inlined_call_operand.hbm [shape: bf16[128,128], index: 3, kind: input, shape index: {}]   ;;  %s609_s4 = inlined_call_operand.vmem [shape: f32[1,128], index: 4, kind: input, shape index: {}]   ;;  %s610_s5 = inlined_call_operand.hbm [shape: f32[16,128], index: 5, kind: output, shape index: {}]  }
   0x1   :  { %11 = vsyncpa [#allocation7], 0 }
   0x2   :  { %12 = vsyncpa [#allocation5], 0  ;;  %s547_s18 = smov [#allocation6]   ;;  %s548_s20 = smov [#allocation3]  }
   0x3   :  { %s30_s19 = sshll.u32 %s547_s18, 4  ;;  %s18_s21 = sshll.u32 %s548_s20, 4  ;;  %s31_s19 = int_to_ptr.vmem [resolvable:$true] %s30_s19  ;;  %s19_s21 = int_to_ptr.vmem [resolvable:$true] %s18_s21 }
   0x4   :  { %s469_s22 = scalar_lea.vmem %s31_s19, 1024  ;;  %p474_p1 = scmp.lt.s32.totalorder %s31_s19, %s31_s19 }
   0x5   :  { %p470_p0 = scmp.ne.s32.totalorder %s31_s19, %s469_s22  ;;  %p475_p2 = scmp.lt.s32.totalorder %s469_s22, %s469_s22 }
   0x7   :  { %p476_p3 = por %p475_p2, %p474_p1 }
   0x9   :  { %p477_p4 = pnand %p476_p3, %p470_p0 }
   0xb   :  { %480 = shalt.err (!%p477_p4)
}
   0xc   :  { %s549_s23 = smov 64   ;;  %s550_s24 = smov 4  }
   0xd   :  { %36 = dma.hbm_to_vmem [thread:$0]  %s606_s1, 1024, %s31_s19, [#allocation7], %s549_s23, %s549_s23, %s550_s24  }
   0xe   :  { %s489_s27 = scalar_lea.vmem %s19_s21, 128  ;;  %p494_p6 = scmp.lt.s32.totalorder %s19_s21, %s19_s21 }
   0xf   :  { %p490_p5 = scmp.ne.s32.totalorder %s19_s21, %s489_s27  ;;  %p495_p7 = scmp.lt.s32.totalorder %s489_s27, %s489_s27 }
  0x11   :  { %p496_p8 = por %p495_p7, %p494_p6 }
  0x13   :  { %p497_p9 = pnand %p496_p8, %p490_p5 }
  0x15   :  { %500 = shalt.err (!%p497_p9)
}
  0x16   :  { %24 = dma.hbm_to_vmem [thread:$0]  %s605_s0, 128, %s19_s21, [#allocation4], %s549_s23, %s549_s23, %s550_s24  }
  0x17   :  { %s551_s30 = smov [#allocation8]  }
  0x18   :  { %s44_s6 = sshll.u32 %s551_s30, 4  ;;  %s45_s6 = int_to_ptr.vmem [resolvable:$true] %s44_s6 }
  0x19   :  { %s509_s7 = scalar_lea.vmem %s45_s6, 1024  ;;  %p514_p11 = scmp.lt.s32.totalorder %s45_s6, %s45_s6 }
  0x1a   :  { %p510_p10 = scmp.ne.s32.totalorder %s45_s6, %s509_s7  ;;  %p515_p12 = scmp.lt.s32.totalorder %s509_s7, %s509_s7 }
  0x1c   :  { %p516_p13 = por %p515_p12, %p514_p11 }
  0x1e   :  { %p517_p0 = pnand %p516_p13, %p510_p10 }
  0x20   :  { %520 = shalt.err (!%p517_p0)
}
  0x21   :  { %50 = dma.hbm_to_vmem [thread:$0]  %s608_s3, 1024, %s45_s6, [#allocation7], %s549_s23, %s549_s23, %s550_s24  }
  0x22   :  { %541 = dma.done.wait [#allocation4], 128  }
  0x23   :  { %542 = vsyncadd [#allocation4], 4294967168 }
  0x24   :  { %543 = dma.done.wait [#allocation7], 2048  }
  0x25   :  { %544 = vsyncadd [#allocation7], 4294965248  ;;  %v552_v0 = vmov 0.0   ;;  %vm553_vm0 = vmmov 0   ;;  %v440_v1 = vld [vmem:[#allocation6 + $0x38] sm:$0xff]   ;;  %v441_v2 = vld [vmem:[#allocation6 + $0x30] sm:$0xff]  }
  0x26   :  { %390 = vmatprep.subr.bf16.mxu0 %v552_v0  ;;  %406 = vmatprep.mubr.msk.bf16.mxu0 %vm553_vm0, %v552_v0  ;;  %v442_v3 = vld [vmem:[#allocation6 + $0x28] sm:$0xff]   ;;  %v443_v4 = vld [vmem:[#allocation6 + $0x20] sm:$0xff]   ;;  %v444_v5 = vld [vmem:[#allocation6 + $0x18] sm:$0xff]   ;;  %s554_s10 = smov [#allocation9]  }
  0x27   :  { %410 = vmatprep.subr.bf16.mxu1 %v552_v0  ;;  %426 = vmatprep.mubr.msk.bf16.mxu1 %vm553_vm0, %v552_v0  ;;  %v445_v6 = vld [vmem:[#allocation6 + $0x10] sm:$0xff]   ;;  %v446_v7 = vld [vmem:[#allocation6 + $0x8] sm:$0xff]   ;;  %v447_v8 = vld [vmem:[#allocation6] sm:$0xff]   ;;  %s340_s11 = sshll.u32 %s554_s10, 4  ;;  %s341_s11 = int_to_ptr.vmem [resolvable:$true] %s340_s11 }
  0x28   :  { %391 = vmatpush3.bf16.msra.mxu0 %v440_v1  ;;  %v448_v9 = vld [vmem:[#allocation3] sm:$0xff]   ;;  %v450_v11 = vld [vmem:[#allocation8 + $0x30] sm:$0xff]   ;;  %v451_v12 = vld [vmem:[#allocation8 + $0x28] sm:$0xff]   ;;  %s521_s12 = scalar_lea.vmem %s341_s11, 256  ;;  %p526_p2 = scmp.lt.s32.totalorder %s341_s11, %s341_s11 }
  0x29   :  { %392 = vmatprep.subr.bf16.mxu0 %v552_v0  ;;  %v449_v10 = vld [vmem:[#allocation8 + $0x38] sm:$0xff]   ;;  %v452_v13 = vld [vmem:[#allocation8 + $0x20] sm:$0xff]   ;;  %v454_v15 = vld [vmem:[#allocation8 + $0x10] sm:$0xff]   ;;  %p522_p1 = scmp.ne.s32.totalorder %s341_s11, %s521_s12  ;;  %p527_p3 = scmp.lt.s32.totalorder %s521_s12, %s521_s12 }
  0x2a   :  { %411 = vmatpush3.bf16.msra.mxu1 %v449_v10  ;;  %v453_v14 = vld [vmem:[#allocation8 + $0x18] sm:$0xff]   ;;  %v455_v16 = vld [vmem:[#allocation8 + $0x8] sm:$0xff]   ;;  %v456_v17 = vld [vmem:[#allocation8] sm:$0xff]  }
  0x2b   :  { %412 = vmatprep.subr.bf16.mxu1 %v552_v0  ;;  %v353_v18 = vld [vmem:[%s607_s2] ss:$0 sm:$0xff]  ;;  %p528_p4 = por %p527_p3, %p526_p2 }
  0x2c   :  { %393 = vmatpush3.bf16.msra.mxu0 %v441_v2  ;;  %v371_v44 = vld [vmem:[%s609_s4] ss:$0 sm:$0xff] }
  0x2d   :  { %394 = vmatprep.subr.bf16.mxu0 %v552_v0  ;;  %p529_p5 = pnand %p528_p4, %p522_p1 }
  0x2e   :  { %413 = vmatpush3.bf16.msra.mxu1 %v450_v11 }
  0x2f   :  { %414 = vmatprep.subr.bf16.mxu1 %v552_v0 }
  0x30   :  { %395 = vmatpush3.bf16.msra.mxu0 %v442_v3 }
  0x31   :  { %396 = vmatprep.subr.bf16.mxu0 %v552_v0 }
  0x32   :  { %415 = vmatpush3.bf16.msra.mxu1 %v451_v12 }
  0x33   :  { %416 = vmatprep.subr.bf16.mxu1 %v552_v0 }
  0x34   :  { %397 = vmatpush3.bf16.msra.mxu0 %v443_v4 }
  0x35   :  { %398 = vmatprep.subr.bf16.mxu0 %v552_v0 }
  0x36   :  { %417 = vmatpush3.bf16.msra.mxu1 %v452_v13 }
  0x37   :  { %418 = vmatprep.subr.bf16.mxu1 %v552_v0 }
  0x38   :  { %399 = vmatpush3.bf16.msra.mxu0 %v444_v5 }
  0x39   :  { %400 = vmatprep.subr.bf16.mxu0 %v552_v0 }
  0x3a   :  { %419 = vmatpush3.bf16.msra.mxu1 %v453_v14 }
  0x3b   :  { %420 = vmatprep.subr.bf16.mxu1 %v552_v0 }
  0x3c   :  { %401 = vmatpush3.bf16.msra.mxu0 %v445_v6 }
  0x3d   :  { %402 = vmatprep.subr.bf16.mxu0 %v552_v0 }
  0x3e   :  { %421 = vmatpush3.bf16.msra.mxu1 %v454_v15 }
  0x3f   :  { %422 = vmatprep.subr.bf16.mxu1 %v552_v0 }
  0x40   :  { %403 = vmatpush3.bf16.msra.mxu0 %v446_v7 }
  0x41   :  { %404 = vmatprep.subr.bf16.mxu0 %v552_v0 }
  0x42   :  { %423 = vmatpush3.bf16.msra.mxu1 %v455_v16 }
  0x43   :  { %424 = vmatprep.subr.bf16.mxu1 %v552_v0 }
  0x44   :  { %405 = vmatpush3.bf16.msra.mxu0 %v447_v8 }
  0x46   :  { %425 = vmatpush3.bf16.msra.mxu1 %v456_v17 }
  0x47   :  { %407 = vmatmul.mubr.bf16.vlgmr.msra.gmra.mxu0 %v448_v9 }
 0x107   :  { %v182_v19 = vpop.f32.mrf.mxu0 }
 0x108   :  { %v183_v20 = vadd.f32 %v353_v18, %v182_v19 }
 0x109   :  { %v408_v21 = vpop.f32.mrf.mxu0 }
 0x10a   :  { %v191_v22 = vmul.f32 0.044715, %v183_v20  ;;  %v189_v38 = vmul.f32 0.5, %v183_v20 }
 0x10b   :  { %v185_v23 = vpop.f32.mrf.mxu0 }
 0x10c   :  { %v193_v24 = vmul.f32 %v191_v22, %v183_v20  ;;  %v186_v25 = vadd.f32 %v353_v18, %v185_v23 }
 0x10d   :  { %v409_v26 = vpop.f32.mrf.mxu0 }
 0x10e   :  { %v195_v27 = vmul.f32 %v193_v24, %v183_v20  ;;  %v192_v28 = vmul.f32 0.044715, %v186_v25  ;;  %v190_v39 = vmul.f32 0.5, %v186_v25 }
 0x110   :  { %v194_v29 = vmul.f32 %v192_v28, %v186_v25  ;;  %v197_v30 = vadd.f32 %v195_v27, %v183_v20 }
 0x112   :  { %v196_v31 = vmul.f32 %v194_v29, %v186_v25  ;;  %v199_v32 = vmul.f32 0.7978846, %v197_v30 }
 0x114   :  { %v198_v33 = vadd.f32 %v196_v31, %v186_v25  ;;  %457 = vtanh.f32 %v199_v32 }
 0x116   :  { %v200_v34 = vmul.f32 0.7978846, %v198_v33 }
 0x118   :  { %459 = vtanh.f32 %v200_v34 }
 0x121   :  { %v458_v35 = vpop.eup %457 }
 0x122   :  { %v203_v36 = vadd.f32 1.0, %v458_v35 }
 0x124   :  { %v205_v41 = vmul.f32 %v203_v36, %v189_v38 }
 0x125   :  { %v460_v37 = vpop.eup %459 }
 0x126   :  { %v204_v40 = vadd.f32 1.0, %v460_v37 }
 0x128   :  { %v206_v42 = vmul.f32 %v204_v40, %v190_v39 }
 0x12a   :  { %v209_v43 = vpack.c.bf16 %v206_v42, %v205_v41 }
 0x12c   :  { %427 = vmatmul.mubr.bf16.vlgmr.msra.gmra.mxu1 %v209_v43 }
 0x1ec   :  { %v308_v45 = vpop.f32.mrf.mxu1 }
 0x1ed   :  { %v331_v46 = vadd.f32 %v371_v44, %v308_v45 }
 0x1ee   :  { %v428_v47 = vpop.f32.mrf.mxu1 }
 0x1ef   :  { %333 = vst [vmem:[#allocation9] sm:$0xff] %v331_v46 }
 0x1f0   :  { %v311_v48 = vpop.f32.mrf.mxu1 }
 0x1f1   :  { %v332_v49 = vadd.f32 %v371_v44, %v311_v48 }
 0x1f2   :  { %v429_v50 = vpop.f32.mrf.mxu1 }
 0x1f3   :  { %334 = vst [vmem:[#allocation9 + $0x8] sm:$0xff] %v332_v49 }
 0x1f4   :  { %532 = shalt.err (!%p529_p5)
}
 0x1f5   :  { %s555_s13 = smov 128   ;;  %s556_s4 = smov 8  }
 0x1f6   :  { %346 = dma.vmem_to_hbm [thread:$0]  %s341_s11, 256, %s610_s5, [#allocation5], %s555_s13, %s555_s13, %s556_s4  }
 0x1f7   :  { %545 = dma.done.wait [#allocation5], 256  }
 0x1f8   :  { %546 = vsyncadd [#allocation5], 4294967040 }
 0x1f9   :  { %350 = vsyncpa [#allocation4], 1 }
 0x1fa   :  { %351 = vsyncpa [#allocation7], 1 }
 0x1fb   :  { %352 = vsyncpa [#allocation5], 1 }

</bundles_post_ra>
